<compile_context>
chip_gen: v7x
topology: tpu7x:2x2x1
jax: 0.10.0
libtpu: 0.0.40
codegen_flags: <defaults>
</compile_context>

<pallas_src>
import functools

import jax
import jax.numpy as jnp
from jax.experimental import pallas as pl
from jax.experimental.pallas import tpu as pltpu


_NEG_LARGE = -1e30                      # mask value baked into padded output-bias lanes
_VMEM_BUDGET = 48 * 1024 * 1024         # conservative: fits v7x's 64 MiB/TC with headroom


def _round_up(n, m):
    return ((n + m - 1) // m) * m


# ---------------------------------------------------------------------------
# Fused kernel: all hidden linears + ReLU + output linear + log-softmax
# ---------------------------------------------------------------------------
def _fused_head_kernel(*refs, num_hidden):
    # refs = (x_ref, W0, b0, W1, b1, ..., W_out, b_out, o_ref)
    x_ref = refs[0]
    o_ref = refs[-1]
    wb = refs[1:-1]

    h = x_ref[...]                      # bf16 batch tile

    # Hidden layers: bf16 matmul, f32 accumulate, f32 bias + ReLU.
    # Zero-padded lanes stay exactly 0 (relu(0 + 0) = 0) and the next layer's
    # padded weight rows are 0, so padding is inert.
    for i in range(num_hidden):
        w = wb[2 * i][...]              # bf16 (Ip, Op)
        b = wb[2 * i + 1][...]          # f32  (1, Op)
        h = jnp.dot(h, w, preferred_element_type=jnp.float32) + b
        h = jnp.maximum(h, 0.0).astype(jnp.bfloat16)
        # dropout: identity (eval mode)

    # Output linear. Padded logit lanes get W_out columns of 0 plus a bias of
    # _NEG_LARGE, so they cannot pollute the max / LSE below.
    w = wb[2 * num_hidden][...]
    b = wb[2 * num_hidden + 1][...]
    logits = jnp.dot(h, w, preferred_element_type=jnp.float32) + b   # f32

    # Numerically stable log-softmax over axis=1 (features), all in f32.
    m = jnp.max(logits, axis=1, keepdims=True)
    shifted = logits - m
    lse = jnp.log(jnp.sum(jnp.exp(shifted), axis=1, keepdims=True))
    o_ref[...] = (shifted - lse).astype(o_ref.dtype)


# ---------------------------------------------------------------------------
# Wrapper: pad to lane/sublane-friendly shapes, one pallas_call, slice result
# ---------------------------------------------------------------------------
def classification_head_forward(x, params, *, max_tile_b=512):
    """params = {"hidden": [(W(In,Out), b(1,Out)), ...], "output": (W, b)}"""
    hidden = params["hidden"]
    w_out, b_out = params["output"]

    B, in_size = x.shape
    out_size = w_out.shape[1]
    num_hidden = len(hidden)

    # ---- padded sizes (lane dim -> x128, batch -> x8 sublanes) -------------
    layers = list(hidden) + [(w_out, b_out)]
    dims = [in_size] + [w.shape[1] for (w, _) in layers]
    dims_p = [_round_up(d, 128) for d in dims]
    out_pad = dims_p[-1]

    # VMEM-resident weight/bias footprint (bf16 weights, f32 biases).
    weight_bytes = sum(2 * dims_p[i] * dims_p[i + 1] + 4 * dims_p[i + 1]
                       for i in range(len(layers)))

    def stream_bytes(tb):
        # x tile (bf16, double-buffered) + out tile (f32, double-buffered)
        # + widest live intermediate (f32 + bf16 copies).
        return (2 * tb * dims_p[0] * 2
                + 2 * tb * out_pad * 4
                + tb * max(dims_p) * (4 + 2))

    # ---- pick a batch tile that fits the VMEM budget ------------------------
    tile_b = max(8, min(_round_up(max_tile_b, 8), _round_up(B, 8)))
    while tile_b > 8 and weight_bytes + stream_bytes(tile_b) > _VMEM_BUDGET:
        tile_b = max(8, _round_up(tile_b // 2, 8))

    b_pad = _round_up(B, tile_b)
    steps = b_pad // tile_b
    if steps > 1 and steps % 2 == 1:     # even split across v7x's 2 TensorCores
        b_pad += tile_b
        steps += 1

    footprint = weight_bytes + stream_bytes(tile_b)
    vmem_limit = int(min(56 * 1024 * 1024,
                         max(32 * 1024 * 1024, footprint + 8 * 1024 * 1024)))

    # ---- pad inputs / weights -----------------------------------------------
    # x: bf16 for the MXU; zero pad rows/lanes.
    x_p = jnp.pad(x.astype(jnp.float32),
                  ((0, b_pad - B), (0, dims_p[0] - in_size))).astype(jnp.bfloat16)

    flat_inputs = []
    in_specs = [pl.BlockSpec((tile_b, dims_p[0]), lambda i: (i, 0))]
    resident = pl.BlockSpec(memory_space=pltpu.MemorySpace.VMEM)
    for li, (w, b) in enumerate(layers):
        is_output = (li == len(layers) - 1)
        ip, op = dims_p[li], dims_p[li + 1]
        w_p = jnp.pad(w.astype(jnp.float32),
                      ((0, ip - w.shape[0]), (0, op - w.shape[1]))
                      ).astype(jnp.bfloat16)
        # Output bias: bake the padded-lane mask into the bias (padded W_out
        # columns are already 0, so padded logits become exactly _NEG_LARGE).
        pad_val = _NEG_LARGE if is_output else 0.0
        b_p = jnp.pad(b.astype(jnp.float32).reshape(1, -1),
                      ((0, 0), (0, op - b.shape[-1])),
                      constant_values=pad_val)
        flat_inputs += [w_p, b_p]
        in_specs += [resident, resident]

    out_spec = pl.BlockSpec((tile_b, out_pad), lambda i: (i, 0))

    # ---- advisory cost estimate ---------------------------------------------
    flops = 2 * b_pad * sum(dims_p[i] * dims_p[i + 1] for i in range(len(layers)))
    transcendentals = b_pad * out_pad + b_pad            # exp + log
    bytes_accessed = (2 * b_pad * dims_p[0]              # x (bf16)
                      + weight_bytes                     # resident weights/biases
                      + 4 * b_pad * out_pad)             # out (f32)

    kernel = functools.partial(_fused_head_kernel, num_hidden=num_hidden)

    out_p = pl.pallas_call(
        kernel,
        out_shape=jax.ShapeDtypeStruct((b_pad, out_pad), jnp.float32),
        grid=(b_pad // tile_b,),
        in_specs=in_specs,
        out_specs=out_spec,
        compiler_params=pltpu.CompilerParams(
            dimension_semantics=("parallel",),
            vmem_limit_bytes=vmem_limit),
        cost_estimate=pl.CostEstimate(flops=flops,
                                      transcendentals=transcendentals,
                                      bytes_accessed=bytes_accessed),
    )(x_p, *flat_inputs)

    return out_p[:B, :out_size]


# ---------------------------------------------------------------------------
# Deterministic parameter init (synthetic, no checkpoint load)
# ---------------------------------------------------------------------------
def init_params(key, input_size, output_size, hidden_layers):
    params = {"hidden": [], "output": None}
    sizes = [input_size] + list(hidden_layers)
    for i in range(len(hidden_layers)):
        key, kw, kb = jax.random.split(key, 3)
        bound = 1.0 / jnp.sqrt(sizes[i])
        w = jax.random.uniform(kw, (sizes[i], sizes[i + 1]), jnp.float32, -bound, bound)
        b = jax.random.uniform(kb, (1, sizes[i + 1]), jnp.float32, -bound, bound)
        params["hidden"].append((w, b))
    key, kw, kb = jax.random.split(key, 3)
    bound = 1.0 / jnp.sqrt(sizes[-1])
    w_out = jax.random.uniform(kw, (sizes[-1], output_size), jnp.float32, -bound, bound)
    b_out = jax.random.uniform(kb, (1, output_size), jnp.float32, -bound, bound)
    params["output"] = (w_out, b_out)
    return params


# ---------------------------------------------------------------------------
# Pure-JAX references
# ---------------------------------------------------------------------------
def _ref_f32(x, params):
    h = x
    for (w, b) in params["hidden"]:
        h = jnp.maximum(h @ w + b, 0.0)
    w_out, b_out = params["output"]
    return jax.nn.log_softmax(h @ w_out + b_out, axis=1)


def _ref_bf16(x, params):
    # Mirrors the kernel's dtype strategy exactly: bf16 matmul operands,
    # f32 accumulation / bias / softmax.
    h = x.astype(jnp.bfloat16)
    for (w, b) in params["hidden"]:
        acc = jnp.dot(h, w.astype(jnp.bfloat16),
                      preferred_element_type=jnp.float32) + b
        h = jnp.maximum(acc, 0.0).astype(jnp.bfloat16)
    w_out, b_out = params["output"]
    logits = jnp.dot(h, w_out.astype(jnp.bfloat16),
                     preferred_element_type=jnp.float32) + b_out
    return jax.nn.log_softmax(logits, axis=1)


# ---------------------------------------------------------------------------
# Main
# ---------------------------------------------------------------------------
if __name__ == "__main__":
    key = jax.random.PRNGKey(0)

    batch = 8
    input_size = 32
    hidden_layers = [64, 32]
    output_size = 10

    key, kx = jax.random.split(key)
    x = jax.random.normal(kx, (batch, input_size), jnp.float32)

    params = init_params(key, input_size, output_size, hidden_layers)

    out = classification_head_forward(x, params)
    out = jax.block_until_ready(out)
    assert out.shape == (batch, output_size)

    # Exact-algorithm reference (same bf16/f32 mixed precision).
    ref_b = _ref_bf16(x, params)
    assert jnp.allclose(out, ref_b, atol=2e-3, rtol=2e-3)

    # Semantic sanity vs. the pure-f32 module forward (bf16 operand error only).
    ref_f = _ref_f32(x, params)
    assert jnp.allclose(out, ref_f, atol=5e-2, rtol=5e-2)

    # Also exercise the no-hidden-layer path of the module.
    params0 = init_params(jax.random.PRNGKey(1), input_size, output_size, [])
    out0 = jax.block_until_ready(classification_head_forward(x, params0))
    assert jnp.allclose(out0, _ref_bf16(x, params0), atol=2e-3, rtol=2e-3)
    assert jnp.allclose(out0, _ref_f32(x, params0), atol=5e-2, rtol=5e-2)

    print("KERNEL_OK")
</pallas_src>

<mosaic_0001>
module attributes {stable_mosaic.version = 11 : i64} {
  func.func @_fused_head_kernel(%arg0: i32, %arg1: memref<8x128xbf16, #tpu.memory_space<vmem>>, %arg2: memref<128x128xbf16, #tpu.memory_space<vmem>>, %arg3: memref<1x128xf32, #tpu.memory_space<vmem>>, %arg4: memref<128x128xbf16, #tpu.memory_space<vmem>>, %arg5: memref<1x128xf32, #tpu.memory_space<vmem>>, %arg6: memref<128x128xbf16, #tpu.memory_space<vmem>>, %arg7: memref<1x128xf32, #tpu.memory_space<vmem>>, %arg8: memref<8x128xf32, #tpu.memory_space<vmem>>) attributes {dimension_semantics = [#tpu.dimension_semantics<parallel>], iteration_bounds = array<i64: 1>, scalar_prefetch = 0 : i64, scratch_operands = 0 : i64, tpu.core_type = #tpu.core_type<tc>, window_params = [{transform_indices = @transform_0, window_bounds = array<i64: 8, 128>}, {pipeline_mode = #tpu.pipeline_mode<synchronous>, transform_indices = @transform_1, window_bounds = array<i64: 128, 128>}, {pipeline_mode = #tpu.pipeline_mode<synchronous>, transform_indices = @transform_2, window_bounds = array<i64: 1, 128>}, {pipeline_mode = #tpu.pipeline_mode<synchronous>, transform_indices = @transform_3, window_bounds = array<i64: 128, 128>}, {pipeline_mode = #tpu.pipeline_mode<synchronous>, transform_indices = @transform_4, window_bounds = array<i64: 1, 128>}, {pipeline_mode = #tpu.pipeline_mode<synchronous>, transform_indices = @transform_5, window_bounds = array<i64: 128, 128>}, {pipeline_mode = #tpu.pipeline_mode<synchronous>, transform_indices = @transform_6, window_bounds = array<i64: 1, 128>}, {transform_indices = @transform_7, window_bounds = array<i64: 8, 128>}]} {
    %c0 = arith.constant 0 : index
    %c0_0 = arith.constant 0 : index
    %0 = vector.load %arg1[%c0, %c0_0] : memref<8x128xbf16, #tpu.memory_space<vmem>>, vector<8x128xbf16>
    %c0_1 = arith.constant 0 : index
    %c0_2 = arith.constant 0 : index
    %1 = vector.load %arg2[%c0_1, %c0_2] : memref<128x128xbf16, #tpu.memory_space<vmem>>, vector<128x128xbf16>
    %c0_3 = arith.constant 0 : index
    %c0_4 = arith.constant 0 : index
    %2 = vector.load %arg3[%c0_3, %c0_4] : memref<1x128xf32, #tpu.memory_space<vmem>>, vector<1x128xf32>
    %cst = arith.constant dense<0.000000e+00> : vector<8x128xf32>
    %3 = tpu.matmul %0, %1, %cst {dimension_numbers = #tpu.dot_dimension_numbers<[1], [0], [0], [1], [0, 0, 1, 1], [], []>} : vector<8x128xbf16>, vector<128x128xbf16>, vector<8x128xf32> -> vector<8x128xf32>
    %4 = vector.broadcast %2 : vector<1x128xf32> to vector<8x128xf32>
    %5 = arith.addf %3, %4 : vector<8x128xf32>
    %cst_5 = arith.constant 0.000000e+00 : f32
    %6 = vector.broadcast %cst_5 : f32 to vector<8x128xf32>
    %7 = arith.maximumf %5, %6 : vector<8x128xf32>
    %8 = arith.truncf %7 : vector<8x128xf32> to vector<8x128xbf16>
    %c0_6 = arith.constant 0 : index
    %c0_7 = arith.constant 0 : index
    %9 = vector.load %arg4[%c0_6, %c0_7] : memref<128x128xbf16, #tpu.memory_space<vmem>>, vector<128x128xbf16>
    %c0_8 = arith.constant 0 : index
    %c0_9 = arith.constant 0 : index
    %10 = vector.load %arg5[%c0_8, %c0_9] : memref<1x128xf32, #tpu.memory_space<vmem>>, vector<1x128xf32>
    %cst_10 = arith.constant dense<0.000000e+00> : vector<8x128xf32>
    %11 = tpu.matmul %8, %9, %cst_10 {dimension_numbers = #tpu.dot_dimension_numbers<[1], [0], [0], [1], [0, 0, 1, 1], [], []>} : vector<8x128xbf16>, vector<128x128xbf16>, vector<8x128xf32> -> vector<8x128xf32>
    %12 = vector.broadcast %10 : vector<1x128xf32> to vector<8x128xf32>
    %13 = arith.addf %11, %12 : vector<8x128xf32>
    %cst_11 = arith.constant 0.000000e+00 : f32
    %14 = vector.broadcast %cst_11 : f32 to vector<8x128xf32>
    %15 = arith.maximumf %13, %14 : vector<8x128xf32>
    %16 = arith.truncf %15 : vector<8x128xf32> to vector<8x128xbf16>
    %c0_12 = arith.constant 0 : index
    %c0_13 = arith.constant 0 : index
    %17 = vector.load %arg6[%c0_12, %c0_13] : memref<128x128xbf16, #tpu.memory_space<vmem>>, vector<128x128xbf16>
    %c0_14 = arith.constant 0 : index
    %c0_15 = arith.constant 0 : index
    %18 = vector.load %arg7[%c0_14, %c0_15] : memref<1x128xf32, #tpu.memory_space<vmem>>, vector<1x128xf32>
    %cst_16 = arith.constant dense<0.000000e+00> : vector<8x128xf32>
    %19 = tpu.matmul %16, %17, %cst_16 {dimension_numbers = #tpu.dot_dimension_numbers<[1], [0], [0], [1], [0, 0, 1, 1], [], []>} : vector<8x128xbf16>, vector<128x128xbf16>, vector<8x128xf32> -> vector<8x128xf32>
    %20 = vector.broadcast %18 : vector<1x128xf32> to vector<8x128xf32>
    %21 = arith.addf %19, %20 : vector<8x128xf32>
    %cst_17 = arith.constant dense<0xFF800000> : vector<8xf32>
    %22 = vector.multi_reduction <maximumf>, %21, %cst_17 [1] : vector<8x128xf32> to vector<8xf32>
    %23 = vector.shape_cast %22 : vector<8xf32> to vector<8x1xf32>
    %24 = vector.broadcast %23 : vector<8x1xf32> to vector<8x128xf32>
    %25 = arith.subf %21, %24 : vector<8x128xf32>
    %26 = math.exp %25 : vector<8x128xf32>
    %cst_18 = arith.constant dense<0.000000e+00> : vector<8xf32>
    %27 = vector.multi_reduction <add>, %26, %cst_18 [1] : vector<8x128xf32> to vector<8xf32>
    %28 = vector.shape_cast %27 : vector<8xf32> to vector<8x1xf32>
    %29 = math.log %28 : vector<8x1xf32>
    %30 = vector.broadcast %29 : vector<8x1xf32> to vector<8x128xf32>
    %31 = arith.subf %25, %30 : vector<8x128xf32>
    %c0_19 = arith.constant 0 : index
    %c0_20 = arith.constant 0 : index
    %32 = vector.load %arg8[%c0_19, %c0_20] : memref<8x128xf32, #tpu.memory_space<vmem>>, vector<8x128xf32>
    tpu.vector_store %arg8[%c0_19, %c0_20], %31 {strides = array<i32>} : memref<8x128xf32, #tpu.memory_space<vmem>>, vector<8x128xf32>,
    return
  }
  func.func @transform_0(%arg0: i32) -> (i32, i32) {
    %c0_i32 = arith.constant 0 : i32
    %c0_i32_0 = arith.constant 0 : i32
    return %arg0, %c0_i32 : i32, i32
  }
  func.func @transform_1(%arg0: i32) -> (i32, i32) {
    %c0_i32 = arith.constant 0 : i32
    %c0_i32_0 = arith.constant 0 : i32
    %c0_i32_1 = arith.constant 0 : i32
    return %c0_i32, %c0_i32_0 : i32, i32
  }
  func.func @transform_2(%arg0: i32) -> (i32, i32) {
    %c0_i32 = arith.constant 0 : i32
    %c0_i32_0 = arith.constant 0 : i32
    %c0_i32_1 = arith.constant 0 : i32
    return %c0_i32, %c0_i32_0 : i32, i32
  }
  func.func @transform_3(%arg0: i32) -> (i32, i32) {
    %c0_i32 = arith.constant 0 : i32
    %c0_i32_0 = arith.constant 0 : i32
    %c0_i32_1 = arith.constant 0 : i32
    return %c0_i32, %c0_i32_0 : i32, i32
  }
  func.func @transform_4(%arg0: i32) -> (i32, i32) {
    %c0_i32 = arith.constant 0 : i32
    %c0_i32_0 = arith.constant 0 : i32
    %c0_i32_1 = arith.constant 0 : i32
    return %c0_i32, %c0_i32_0 : i32, i32
  }
  func.func @transform_5(%arg0: i32) -> (i32, i32) {
    %c0_i32 = arith.constant 0 : i32
    %c0_i32_0 = arith.constant 0 : i32
    %c0_i32_1 = arith.constant 0 : i32
    return %c0_i32, %c0_i32_0 : i32, i32
  }
  func.func @transform_6(%arg0: i32) -> (i32, i32) {
    %c0_i32 = arith.constant 0 : i32
    %c0_i32_0 = arith.constant 0 : i32
    %c0_i32_1 = arith.constant 0 : i32
    return %c0_i32, %c0_i32_0 : i32, i32
  }
  func.func @transform_7(%arg0: i32) -> (i32, i32) {
    %c0_i32 = arith.constant 0 : i32
    %c0_i32_0 = arith.constant 0 : i32
    return %arg0, %c0_i32 : i32, i32
  }
}

</mosaic_0001>

<bundles_post_ra>
// kernel: tpu_custom_call.1
= control target key start
LH: loop header
LB: loop body
LE: loop exit
PB: predicated region body
PF: predicated region fallthrough
CT: control target
= control target key end

     0   :  { %12 = vsyncpa [#allocation3], 0  ;;  %s873_s0 = inlined_call_operand.hbm [shape: bf16[8,128], index: 0, kind: input, shape index: {}]   ;;  %s874_s1 = inlined_call_operand.hbm [shape: bf16[128,128], index: 1, kind: input, shape index: {}]   ;;  %s875_s2 = inlined_call_operand.vmem [shape: f32[1,128], index: 2, kind: input, shape index: {}]   ;;  %s876_s3 = inlined_call_operand.hbm [shape: bf16[128,128], index: 3, kind: input, shape index: {}]   ;;  %s877_s4 = inlined_call_operand.vmem [shape: f32[1,128], index: 4, kind: input, shape index: {}]   ;;  %s878_s5 = inlined_call_operand.hbm [shape: bf16[128,128], index: 5, kind: input, shape index: {}]   ;;  %s879_s6 = inlined_call_operand.vmem [shape: f32[1,128], index: 6, kind: input, shape index: {}]   ;;  %s880_s7 = inlined_call_operand.hbm [shape: f32[8,128], index: 7, kind: output, shape index: {}]  }
   0x1   :  { %13 = vsyncpa [#allocation6], 0 }
   0x2   :  { %14 = vsyncpa [#allocation9], 0 }
   0x3   :  { %15 = vsyncpa [#allocation4], 0  ;;  %s716_s24 = smov [#allocation5]   ;;  %s598_s28 = scalar_lea.hbm %s874_s1, 1024 }
   0x4   :  { %s31_s25 = sshll.u32 %s716_s24, 4  ;;  %p599_p0 = scmp.ne.s32.totalorder %s874_s1, %s598_s28  ;;  %s32_s25 = int_to_ptr.vmem [resolvable:$true] %s31_s25 }
   0x5   :  { %p602_p1 = scmp.lt.u32.totalorder %s598_s28, %s874_s1 }
   0x7   :  { %p604_p2 = pnand %p602_p1, %p599_p0 }
   0x9   :  { %607 = shalt.err (!%p604_p2)
}
   0xa   :  { %s608_s10 = scalar_lea.vmem %s32_s25, 1024  ;;  %p613_p4 = scmp.lt.s32.totalorder %s32_s25, %s32_s25 }
   0xb   :  { %p609_p3 = scmp.ne.s32.totalorder %s32_s25, %s608_s10  ;;  %p614_p5 = scmp.lt.s32.totalorder %s608_s10, %s608_s10 }
   0xd   :  { %p615_p6 = por %p614_p5, %p613_p4 }
   0xf   :  { %p616_p7 = pnand %p615_p6, %p609_p3 }
  0x11   :  { %619 = shalt.err (!%p616_p7)
}
  0x12   :  { %s717_s11 = smov 64   ;;  %s718_s12 = smov 4  }
  0x13   :  { %37 = dma.hbm_to_vmem [thread:$0]  %s874_s1, 1024, %s32_s25, [#allocation6], %s717_s11, %s717_s11, %s718_s12  }
  0x14   :  { %s719_s15 = smov [#allocation2]   ;;  %s720_s17 = smov [#allocation7]  }
  0x15   :  { %s22_s16 = sshll.u32 %s719_s15, 4  ;;  %s45_s18 = sshll.u32 %s720_s17, 4  ;;  %s23_s16 = int_to_ptr.vmem [resolvable:$true] %s22_s16  ;;  %s46_s18 = int_to_ptr.vmem [resolvable:$true] %s45_s18 }
  0x16   :  { %s620_s21 = scalar_lea.hbm %s873_s0, 64 }
  0x17   :  { %p621_p8 = scmp.ne.s32.totalorder %s873_s0, %s620_s21  ;;  %p624_p9 = scmp.lt.u32.totalorder %s620_s21, %s873_s0 }
  0x19   :  { %p626_p10 = pnand %p624_p9, %p621_p8 }
  0x1b   :  { %629 = shalt.err (!%p626_p10)
}
  0x1c   :  { %s630_s1 = scalar_lea.vmem %s23_s16, 64  ;;  %p635_p12 = scmp.lt.s32.totalorder %s23_s16, %s23_s16 }
  0x1d   :  { %p631_p11 = scmp.ne.s32.totalorder %s23_s16, %s630_s1  ;;  %p636_p13 = scmp.lt.s32.totalorder %s630_s1, %s630_s1 }
  0x1f   :  { %p637_p0 = por %p636_p13, %p635_p12 }
  0x21   :  { %p638_p1 = pnand %p637_p0, %p631_p11 }
  0x23   :  { %641 = shalt.err (!%p638_p1)
}
  0x24   :  { %25 = dma.hbm_to_vmem [thread:$0]  %s873_s0, 64, %s23_s16, [#allocation3]  }
  0x25   :  { %s642_s30 = scalar_lea.hbm %s876_s3, 1024 }
  0x26   :  { %p643_p2 = scmp.ne.s32.totalorder %s876_s3, %s642_s30  ;;  %p646_p3 = scmp.lt.u32.totalorder %s642_s30, %s876_s3 }
  0x28   :  { %p648_p4 = pnand %p646_p3, %p643_p2 }
  0x2a   :  { %651 = shalt.err (!%p648_p4)
}
  0x2b   :  { %s652_s14 = scalar_lea.vmem %s46_s18, 1024  ;;  %p657_p6 = scmp.lt.s32.totalorder %s46_s18, %s46_s18 }
  0x2c   :  { %p653_p5 = scmp.ne.s32.totalorder %s46_s18, %s652_s14  ;;  %p658_p7 = scmp.lt.s32.totalorder %s652_s14, %s652_s14 }
  0x2e   :  { %p659_p8 = por %p658_p7, %p657_p6 }
  0x30   :  { %p660_p9 = pnand %p659_p8, %p653_p5 }
  0x32   :  { %663 = shalt.err (!%p660_p9)
}
  0x33   :  { %51 = dma.hbm_to_vmem [thread:$0]  %s876_s3, 1024, %s46_s18, [#allocation6], %s717_s11, %s717_s11, %s718_s12  }
  0x34   :  { %s721_s16 = smov [#allocation8]   ;;  %s664_s21 = scalar_lea.hbm %s878_s5, 1024 }
  0x35   :  { %s59_s17 = sshll.u32 %s721_s16, 4  ;;  %p665_p10 = scmp.ne.s32.totalorder %s878_s5, %s664_s21  ;;  %s60_s17 = int_to_ptr.vmem [resolvable:$true] %s59_s17 }
  0x36   :  { %p668_p11 = scmp.lt.u32.totalorder %s664_s21, %s878_s5 }
  0x38   :  { %p670_p12 = pnand %p668_p11, %p665_p10 }
  0x3a   :  { %673 = shalt.err (!%p670_p12)
}
  0x3b   :  { %s674_s1 = scalar_lea.vmem %s60_s17, 1024  ;;  %p679_p0 = scmp.lt.s32.totalorder %s60_s17, %s60_s17 }
  0x3c   :  { %p675_p13 = scmp.ne.s32.totalorder %s60_s17, %s674_s1  ;;  %p680_p1 = scmp.lt.s32.totalorder %s674_s1, %s674_s1 }
  0x3e   :  { %p681_p2 = por %p680_p1, %p679_p0 }
  0x40   :  { %p682_p3 = pnand %p681_p2, %p675_p13 }
  0x42   :  { %685 = shalt.err (!%p682_p3)
}
  0x43   :  { %65 = dma.hbm_to_vmem [thread:$0]  %s878_s5, 1024, %s60_s17, [#allocation9], %s717_s11, %s717_s11, %s718_s12  }
  0x44   :  { %708 = dma.done.wait [#allocation3], 64  }
  0x45   :  { %709 = vsyncadd [#allocation3], 4294967232 }
  0x46   :  { %710 = dma.done.wait [#allocation6], 2048  }
  0x47   :  { %711 = vsyncadd [#allocation6], 4294965248 }
  0x48   :  { %712 = dma.done.wait [#allocation9], 1024  }
  0x49   :  { %713 = vsyncadd [#allocation9], 4294966272  ;;  %v722_v0 = vmov 0.0   ;;  %vm723_vm0 = vmmov 0   ;;  %v570_v1 = vld [vmem:[#allocation5] sm:$0xff]   ;;  %v571_v2 = vld [vmem:[#allocation5 + $0x8] sm:$0xff]  }
  0x4a   :  { %501 = vmatprep.subr.bf16.mxu0 %v722_v0  ;;  %517 = vmatprep.mubr.msk.bf16.mxu0 %vm723_vm0, %v722_v0  ;;  %v572_v3 = vld [vmem:[#allocation5 + $0x10] sm:$0xff]   ;;  %v578_v4 = vld [vmem:[#allocation7] sm:$0xff]   ;;  %v573_v5 = vld [vmem:[#allocation5 + $0x18] sm:$0xff]  }
  0x4b   :  { %521 = vmatprep.subr.bf16.mxu1 %v722_v0  ;;  %537 = vmatprep.mubr.msk.bf16.mxu1 %vm723_vm0, %v722_v0  ;;  %v579_v6 = vld [vmem:[#allocation7 + $0x8] sm:$0xff]   ;;  %v574_v7 = vld [vmem:[#allocation5 + $0x20] sm:$0xff]   ;;  %v580_v8 = vld [vmem:[#allocation7 + $0x10] sm:$0xff]  }
  0x4c   :  { %502 = vmatpush3.bf16.msra.mxu0 %v570_v1  ;;  %522 = vmatpush3.bf16.msra.mxu1 %v578_v4  ;;  %v575_v9 = vld [vmem:[#allocation5 + $0x28] sm:$0xff]   ;;  %v581_v10 = vld [vmem:[#allocation7 + $0x18] sm:$0xff]   ;;  %v576_v11 = vld [vmem:[#allocation5 + $0x30] sm:$0xff]  }
  0x4d   :  { %503 = vmatprep.subr.bf16.mxu0 %v722_v0  ;;  %523 = vmatprep.subr.bf16.mxu1 %v722_v0  ;;  %v582_v12 = vld [vmem:[#allocation7 + $0x20] sm:$0xff]   ;;  %v577_v13 = vld [vmem:[#allocation5 + $0x38] sm:$0xff]   ;;  %v583_v14 = vld [vmem:[#allocation7 + $0x28] sm:$0xff]  }
  0x4e   :  { %v81_v15 = vld [vmem:[#allocation2] sm:$0xf]  ;;  %v584_v16 = vld [vmem:[#allocation7 + $0x30] sm:$0xff]   ;;  %v586_v18 = vld [vmem:[#allocation8] sm:$0xff]  }
  0x4f   :  { %v585_v17 = vld [vmem:[#allocation7 + $0x38] sm:$0xff]   ;;  %v587_v19 = vld [vmem:[#allocation8 + $0x8] sm:$0xff]   ;;  %v588_v20 = vld [vmem:[#allocation8 + $0x10] sm:$0xff]  }
  0x50   :  { %504 = vmatpush3.bf16.msra.mxu0 %v571_v2  ;;  %524 = vmatpush3.bf16.msra.mxu1 %v579_v6  ;;  %v589_v21 = vld [vmem:[#allocation8 + $0x18] sm:$0xff]   ;;  %v590_v22 = vld [vmem:[#allocation8 + $0x20] sm:$0xff]   ;;  %v591_v23 = vld [vmem:[#allocation8 + $0x28] sm:$0xff]  }
  0x51   :  { %505 = vmatprep.subr.bf16.mxu0 %v722_v0  ;;  %525 = vmatprep.subr.bf16.mxu1 %v722_v0  ;;  %v447_v24 = vld [vmem:[%s875_s2] ss:$0 sm:$0xff]  ;;  %v592_v32 = vld [vmem:[#allocation8 + $0x30] sm:$0xff]  }
  0x52   :  { %v593_v33 = vld [vmem:[#allocation8 + $0x38] sm:$0xff]  }
  0x53   :  { %v456_v34 = vld [vmem:[%s877_s4] ss:$0 sm:$0xff]  ;;  %s724_s4 = smov [#allocation10]  }
  0x54   :  { %506 = vmatpush3.bf16.msra.mxu0 %v572_v3  ;;  %526 = vmatpush3.bf16.msra.mxu1 %v580_v8  ;;  %v465_v42 = vld [vmem:[%s879_s6] ss:$0 sm:$0xff]  ;;  %s436_s28 = sshll.u32 %s724_s4, 4  ;;  %s437_s28 = int_to_ptr.vmem [resolvable:$true] %s436_s28 }
  0x55   :  { %507 = vmatprep.subr.bf16.mxu0 %v722_v0  ;;  %527 = vmatprep.subr.bf16.mxu1 %v722_v0  ;;  %s686_s6 = scalar_lea.vmem %s437_s28, 128  ;;  %p691_p5 = scmp.lt.s32.totalorder %s437_s28, %s437_s28 }
  0x56   :  { %p687_p4 = scmp.ne.s32.totalorder %s437_s28, %s686_s6  ;;  %p692_p6 = scmp.lt.s32.totalorder %s686_s6, %s686_s6 }
  0x58   :  { %508 = vmatpush3.bf16.msra.mxu0 %v573_v5  ;;  %528 = vmatpush3.bf16.msra.mxu1 %v581_v10  ;;  %p693_p7 = por %p692_p6, %p691_p5 }
  0x59   :  { %509 = vmatprep.subr.bf16.mxu0 %v722_v0  ;;  %529 = vmatprep.subr.bf16.mxu1 %v722_v0 }
  0x5a   :  { %p694_p8 = pnand %p693_p7, %p687_p4 }
  0x5c   :  { %510 = vmatpush3.bf16.msra.mxu0 %v574_v7  ;;  %530 = vmatpush3.bf16.msra.mxu1 %v582_v12 }
  0x5d   :  { %511 = vmatprep.subr.bf16.mxu0 %v722_v0  ;;  %531 = vmatprep.subr.bf16.mxu1 %v722_v0 }
  0x60   :  { %512 = vmatpush3.bf16.msra.mxu0 %v575_v9  ;;  %532 = vmatpush3.bf16.msra.mxu1 %v583_v14 }
  0x61   :  { %513 = vmatprep.subr.bf16.mxu0 %v722_v0  ;;  %533 = vmatprep.subr.bf16.mxu1 %v722_v0 }
  0x64   :  { %514 = vmatpush3.bf16.msra.mxu0 %v576_v11  ;;  %534 = vmatpush3.bf16.msra.mxu1 %v584_v16 }
  0x65   :  { %515 = vmatprep.subr.bf16.mxu0 %v722_v0  ;;  %535 = vmatprep.subr.bf16.mxu1 %v722_v0 }
  0x68   :  { %516 = vmatpush3.bf16.msra.mxu0 %v577_v13  ;;  %536 = vmatpush3.bf16.msra.mxu1 %v585_v17 }
  0x69   :  { %541 = vmatprep.subr.bf16.mxu0 %v722_v0 }
  0x6b   :  { %518 = vmatmul.mubr.bf16.vlgmr.msra.gmra.mrb[0].mxu0 %v81_v15 }
  0x6c   :  { %557 = vmatprep.mubr.msk.bf16.mxu0 %vm723_vm0, %v722_v0  ;;  %542 = vmatpush3.bf16.msra.mxu0 %v586_v18 }
  0x6d   :  { %543 = vmatprep.subr.bf16.mxu0 %v722_v0 }
  0x70   :  { %544 = vmatpush3.bf16.msra.mxu0 %v587_v19 }
  0x71   :  { %545 = vmatprep.subr.bf16.mxu0 %v722_v0 }
  0x74   :  { %546 = vmatpush3.bf16.msra.mxu0 %v588_v20 }
  0x75   :  { %547 = vmatprep.subr.bf16.mxu0 %v722_v0 }
  0x78   :  { %548 = vmatpush3.bf16.msra.mxu0 %v589_v21 }
  0x79   :  { %549 = vmatprep.subr.bf16.mxu0 %v722_v0 }
  0x7c   :  { %550 = vmatpush3.bf16.msra.mxu0 %v590_v22 }
  0x7d   :  { %551 = vmatprep.subr.bf16.mxu0 %v722_v0 }
  0x80   :  { %552 = vmatpush3.bf16.msra.mxu0 %v591_v23 }
  0x81   :  { %553 = vmatprep.subr.bf16.mxu0 %v722_v0 }
  0x84   :  { %554 = vmatpush3.bf16.msra.mxu0 %v592_v32 }
  0x85   :  { %555 = vmatprep.subr.bf16.mxu0 %v722_v0 }
  0x88   :  { %556 = vmatpush3.bf16.msra.mxu0 %v593_v33 }
 0x13e   :  { %v187_v25 = vpop.f32.mrb[0].mxu0 }
 0x13f   :  { %v188_v26 = vadd.f32 %v447_v24, %v187_v25  ;;  %v519_v27 = vpop.f32.mrb[1].mxu0 }
 0x140   :  { %v190_v28 = vpop.f32.mrb[2].mxu0 }
 0x141   :  { %v193_v29 = vmax.f32 %v188_v26, 0.0  ;;  %v520_v30 = vpop.f32.mrb[3].mxu0 }
 0x143   :  { %v194_v31 = vpack.c.bf16 %v193_v29, %v193_v29 }
 0x145   :  { %538 = vmatmul.mubr.bf16.vlgmr.msra.gmra.mrb[0].mxu1 %v194_v31 }
 0x218   :  { %v300_v35 = vpop.f32.mrb[0].mxu1 }
 0x219   :  { %v301_v36 = vadd.f32 %v456_v34, %v300_v35  ;;  %v539_v37 = vpop.f32.mrb[1].mxu1 }
 0x21a   :  { %v303_v38 = vpop.f32.mrb[2].mxu1 }
 0x21b   :  { %v306_v39 = vmax.f32 %v301_v36, 0.0  ;;  %v540_v40 = vpop.f32.mrb[3].mxu1 }
 0x21d   :  { %v307_v41 = vpack.c.bf16 %v306_v39, %v306_v39 }
 0x21f   :  { %558 = vmatmul.mubr.bf16.vlgmr.msra.gmra.mrb[4].mxu0 %v307_v41 }
 0x2f2   :  { %v413_v43 = vpop.f32.mrb[4].mxu0 }
 0x2f3   :  { %v414_v44 = vadd.f32 %v465_v42, %v413_v43  ;;  %v559_v45 = vpop.f32.mrb[5].mxu0 }
 0x2f4   :  { %v416_v46 = vpop.f32.mrb[6].mxu0 }
 0x2f5   :  { %419 = vmax.xlane.f32.xlu0 %v414_v44  ;;  %v560_v47 = vpop.f32.mrb[7].mxu0 }
 0x382   :  { %v420_v48 = vpop.xlane.xlu0 %419 }
 0x383   :  { %v421_v49 = vsub.f32 %v414_v44, %v420_v48 }
 0x385   :  { %v422_v50 = vmul.f32 1.442695, %v421_v49 }
 0x387   :  { %594 = vpow2.f32 %v422_v50 }
 0x391   :  { %v595_v51 = vpop.eup %594 }
 0x392   :  { %424 = vadd.xlane.f32.xlu0 %v595_v51 }
 0x41f   :  { %v425_v52 = vpop.xlane.xlu0 %424 }
 0x420   :  { %596 = vlog2.f32 %v425_v52 }
 0x42a   :  { %v597_v53 = vpop.eup %596 }
 0x42b   :  { %v427_v54 = vmul.f32 0.6931472, %v597_v53 }
 0x42d   :  { %v428_v55 = vsub.f32 %v421_v49, %v427_v54 }
 0x42f   :  { %429 = vst [vmem:[#allocation10] sm:$0xff] %v428_v55 }
 0x430   :  { %697 = shalt.err (!%p694_p8)
}
 0x431   :  { %s698_s8 = scalar_lea.hbm %s880_s7, 128 }
 0x432   :  { %p699_p9 = scmp.ne.s32.totalorder %s880_s7, %s698_s8  ;;  %p702_p10 = scmp.lt.u32.totalorder %s698_s8, %s880_s7 }
 0x434   :  { %p704_p11 = pnand %p702_p10, %p699_p9 }
 0x436   :  { %707 = shalt.err (!%p704_p11)
}
 0x437   :  { %439 = dma.vmem_to_hbm [thread:$0]  %s437_s28, 128, %s880_s7, [#allocation4]  }
 0x438   :  { %714 = dma.done.wait [#allocation4], 128  }
 0x439   :  { %715 = vsyncadd [#allocation4], 4294967168 }
 0x43a   :  { %443 = vsyncpa [#allocation3], 1 }
 0x43b   :  { %444 = vsyncpa [#allocation6], 1 }
 0x43c   :  { %445 = vsyncpa [#allocation9], 1 }
 0x43d   :  { %446 = vsyncpa [#allocation4], 1 }

</bundles_post_ra>
